<compile_context>
chip_gen: v7x
topology: tpu7x:2x2x1
jax: 0.10.0
libtpu: 0.0.40
codegen_flags: <defaults>
</compile_context>

<pallas_src>
import functools

import jax
import jax.numpy as jnp
from jax import lax
from jax.experimental import pallas as pl
from jax.experimental.pallas import tpu as pltpu


# ------------------------------ small helpers ------------------------------ #

def _round_up(x, m):
    return ((x + m - 1) // m) * m


def _weight_norm(v, g):
    """PyTorch weight_norm (dim=0): w = g * v / ||v|| over dims (1, 2)."""
    norm = jnp.sqrt(jnp.sum(v * v, axis=(1, 2), keepdims=True))
    return g * v / norm


def _pack_conv_weight(w_oik, cin_p, cout_p):
    """(Cout, Cin, K) PyTorch conv weight -> (K*Cin_p, Cout_p) matmul operand."""
    cout, cin, k = w_oik.shape
    w = jnp.transpose(w_oik, (2, 1, 0))                    # (K, Cin, Cout)
    w = jnp.pad(w, ((0, 0), (0, cin_p - cin), (0, cout_p - cout)))
    return w.reshape(k * cin_p, cout_p)


def _pack_bias(b, cout_p):
    return jnp.pad(b.reshape(1, -1), ((0, 0), (0, cout_p - b.shape[0])))


# ------------------------------ fused kernel ------------------------------- #

def _tcn_block_kernel(x_hbm, w1_ref, b1_ref, w2_ref, b2_ref, *rest,
                      K, dilation, tile, halo_x, halo_y, off0, seq_rows,
                      n_tiles, has_downsample):
    """Fused TemporalBlock forward for one (batch, L-tile) grid point.

    x_hbm : (B*seq_rows, Cin_p) in HBM (pl.ANY); each batch row is left-padded
            with halo_x zero rows on the host, so every tile's DMA is uniform.
    w1_ref: (K*Cin_p, Cout_p)   packed conv1 weight (tap-major, then cin)
    b1_ref: (1, Cout_p) f32
    w2_ref: (K*Cout_p, Cout_p)  packed conv2 weight
    b2_ref: (1, Cout_p) f32
    [wds_ref: (Cin_p, Cout_p), bds_ref: (1, Cout_p)]  only if has_downsample
    o_ref : (tile, Cout_p)
    xbuf  : (2, tile + halo_x, Cin_p) VMEM  -- double-buffered x window
    y1buf : (tile + halo_y, Cout_p)   VMEM  -- conv1 activations (+ halo)
    sem   : DMA semaphores, shape (2,)
    """
    if has_downsample:
        wds_ref, bds_ref, o_ref, xbuf, y1buf, sem = rest
    else:
        o_ref, xbuf, y1buf, sem = rest

    b = pl.program_id(0)
    i = pl.program_id(1)
    slot = i % 2
    d = dilation
    rows_x = tile + halo_x
    rows1 = tile + halo_y
    cin_p = xbuf.shape[-1]
    cout_p = o_ref.shape[-1]
    base = b * seq_rows

    # ---- pipelined x-window fetch: wait on this tile, prefetch the next ---- #
    def start_fetch(ti, sl):
        pltpu.make_async_copy(
            x_hbm.at[pl.ds(base + ti * tile, rows_x), :],
            xbuf.at[sl], sem.at[sl]).start()

    @pl.when(i == 0)                      # prime the pipeline once per batch row
    def _():
        start_fetch(0, 0)

    # Wait for this step's window (descriptor shapes match every start above).
    pltpu.make_async_copy(
        x_hbm.at[pl.ds(0, rows_x), :], xbuf.at[slot], sem.at[slot]).wait()

    @pl.when(i + 1 < n_tiles)             # prefetch next L-tile of this batch
    def _():
        start_fetch(i + 1, 1 - slot)

    # ---- conv1 (+bias, ReLU): K accumulated MXU matmuls over shifted slices -- #
    acc1 = None
    for k in range(K):
        part = jnp.dot(xbuf[slot, pl.ds(off0 + k * d, rows1), :],
                       w1_ref[pl.ds(k * cin_p, cin_p), :],
                       preferred_element_type=jnp.float32)
        acc1 = part if acc1 is None else acc1 + part
    y1 = jnp.maximum(acc1 + b1_ref[...].astype(jnp.float32), 0.0)
    y1buf[...] = y1.astype(y1buf.dtype)

    # conv2's causal zero padding: y1 rows whose global time is < 0 must be
    # exactly 0 (not ReLU(b1)).  Only the first ceil(halo_y / tile) tiles can
    # contain such rows, so gate the mask work.
    if halo_y > 0:
        @pl.when(i * tile < halo_y)
        def _():
            t_idx = (i * tile - halo_y
                     + lax.broadcasted_iota(jnp.int32, (rows1, 1), 0))
            y1buf[...] = jnp.where(t_idx >= 0, y1buf[...], 0).astype(y1buf.dtype)

    # ---- conv2 (+bias, ReLU) for the tile's output rows -------------------- #
    acc2 = None
    for k in range(K):
        part = jnp.dot(y1buf[pl.ds(k * d, tile), :],
                       w2_ref[pl.ds(k * cout_p, cout_p), :],
                       preferred_element_type=jnp.float32)
        acc2 = part if acc2 is None else acc2 + part
    y2 = jnp.maximum(acc2 + b2_ref[...].astype(jnp.float32), 0.0)

    # ---- residual path (fused 1x1 downsample or identity) + final ReLU ----- #
    x_res = xbuf[slot, pl.ds(halo_x, tile), :]
    if has_downsample:
        res = jnp.dot(x_res, wds_ref[...], preferred_element_type=jnp.float32)
        res = res + bds_ref[...].astype(jnp.float32)
    else:
        res = x_res.astype(jnp.float32)

    o_ref[...] = jnp.maximum(y2 + res, 0.0).astype(o_ref.dtype)


# ------------------------------ module wrapper ------------------------------ #

def temporal_block_forward(x_ncl, params, *, kernel_size, stride, dilation,
                           padding, dropout=0.2, tile_l=None,
                           dtype=jnp.float32):
    """x_ncl: (B, C_in, L)  ->  (B, C_out, L)   (PyTorch NCL convention)."""
    del dropout  # identity at inference
    if stride != 1:
        raise NotImplementedError("stride > 1 not supported (TCN uses stride=1)")
    K = kernel_size
    if padding != dilation * (K - 1):
        raise ValueError(
            "TemporalBlock's residual add requires "
            "padding == dilation * (kernel_size - 1) "
            f"(got padding={padding}, dilation={dilation}, kernel_size={K})")

    B, Cin, L = x_ncl.shape
    Cout = params["b1"].shape[0]
    has_downsample = "w_ds" in params
    if not has_downsample and Cin != Cout:
        raise ValueError("params lack 'w_ds' but n_inputs != n_outputs")

    halo_y = dilation * (K - 1)            # conv2's causal receptive offset
    halo_x = _round_up(2 * halo_y, 8)      # x halo, sublane-aligned DMA windows
    off0 = halo_x - 2 * halo_y             # alignment slack inside the x window

    # Lane-dense channel padding (multiples of 128).
    Cin_p = _round_up(Cin, 128)
    Cout_p = _round_up(Cout, 128)
    act = jnp.dtype(dtype).itemsize

    # Generation-aware VMEM budget (v5e/v6e: 128 MiB, v7x: 64 MiB per core).
    try:
        vmem_cap = int(pltpu.get_tpu_info().vmem_capacity_bytes)
    except Exception:
        vmem_cap = 128 * 1024 * 1024
    budget = int(0.80 * vmem_cap)          # headroom for compiler scratch

    w_bytes = (K * Cin_p * Cout_p + K * Cout_p * Cout_p) * act + 2 * Cout_p * 4
    if has_downsample:
        w_bytes += Cin_p * Cout_p * act + Cout_p * 4

    def vmem_need(t):
        return (2 * t * Cout_p * act                    # output (double-buffered)
                + 2 * (t + halo_x) * Cin_p * act        # xbuf (2 prefetch slots)
                + (t + halo_y) * Cout_p * act           # y1buf
                + 2 * w_bytes                           # resident weights (2x buffered)
                + 2 * (t + halo_y) * Cout_p * 4)        # f32 matmul accumulators

    if tile_l is None:
        tile_l = 512 if vmem_cap >= (96 << 20) else 256     # v5e/v6e vs v7x
        tile_l = max(tile_l, 2 * halo_x)                    # bound halo recompute
    tile = _round_up(max(8, min(tile_l, L)), 8)
    while tile > 8 and vmem_need(tile) > budget:            # shrink to fit VMEM
        tile = max(8, _round_up(tile // 2, 8))

    Lt = _round_up(L, tile)
    n_tiles = Lt // tile
    seq_rows = halo_x + Lt
    vmem_limit = int(min(budget, max(32 << 20, 2 * vmem_need(tile))))

    # Channels-last; causal left pad (halo_x zero rows) + right pad to Lt;
    # pad channels to lanes; flatten (B, seq_rows) rows.
    x = jnp.transpose(x_ncl, (0, 2, 1)).astype(jnp.float32)       # (B, L, Cin)
    x = jnp.pad(x, ((0, 0), (halo_x, Lt - L), (0, Cin_p - Cin)))
    x2d = x.reshape(B * seq_rows, Cin_p).astype(dtype)

    # Effective (weight-normalized) conv weights packed for MXU matmuls.
    w1m = _pack_conv_weight(_weight_norm(params["v1"], params["g1"]),
                            Cin_p, Cout_p).astype(dtype)
    w2m = _pack_conv_weight(_weight_norm(params["v2"], params["g2"]),
                            Cout_p, Cout_p).astype(dtype)
    b1 = _pack_bias(params["b1"], Cout_p)                        # f32
    b2 = _pack_bias(params["b2"], Cout_p)                        # f32

    inputs = [x2d, w1m, b1, w2m, b2]
    in_specs = [
        pl.BlockSpec(memory_space=pl.ANY),                        # x: manual DMA
        pl.BlockSpec((K * Cin_p, Cout_p), lambda b, i: (0, 0)),
        pl.BlockSpec((1, Cout_p), lambda b, i: (0, 0)),
        pl.BlockSpec((K * Cout_p, Cout_p), lambda b, i: (0, 0)),
        pl.BlockSpec((1, Cout_p), lambda b, i: (0, 0)),
    ]
    if has_downsample:
        wdsm = _pack_conv_weight(params["w_ds"], Cin_p, Cout_p).astype(dtype)
        bds = _pack_bias(params["b_ds"], Cout_p)                 # f32
        inputs += [wdsm, bds]
        in_specs += [
            pl.BlockSpec((Cin_p, Cout_p), lambda b, i: (0, 0)),
            pl.BlockSpec((1, Cout_p), lambda b, i: (0, 0)),
        ]

    kern = functools.partial(
        _tcn_block_kernel, K=K, dilation=dilation, tile=tile,
        halo_x=halo_x, halo_y=halo_y, off0=off0, seq_rows=seq_rows,
        n_tiles=n_tiles, has_downsample=has_downsample)

    out2d = pl.pallas_call(
        kern,
        out_shape=jax.ShapeDtypeStruct((B * Lt, Cout_p), dtype),
        grid=(B, n_tiles),
        in_specs=in_specs,
        out_specs=pl.BlockSpec((tile, Cout_p),
                               lambda b, i: (b * n_tiles + i, 0)),
        scratch_shapes=[
            pltpu.VMEM((2, tile + halo_x, Cin_p), dtype),
            pltpu.VMEM((tile + halo_y, Cout_p), dtype),
            pltpu.SemaphoreType.DMA((2,)),
        ],
        compiler_params=pltpu.CompilerParams(
            dimension_semantics=("parallel", "arbitrary"),
            vmem_limit_bytes=vmem_limit),
    )(*inputs)

    out = out2d.reshape(B, Lt, Cout_p)[:, :L, :Cout]
    return jnp.transpose(out, (0, 2, 1)).astype(x_ncl.dtype)


# -------------------------------- params init ------------------------------- #

def init_temporal_block_params(key, n_inputs, n_outputs, kernel_size):
    """Deterministic parameter init (shapes follow TemporalBlock.__init__)."""
    ks = jax.random.split(key, 6)
    v1 = jax.random.normal(ks[0], (n_outputs, n_inputs, kernel_size),
                           jnp.float32) * 0.1
    v2 = jax.random.normal(ks[1], (n_outputs, n_outputs, kernel_size),
                           jnp.float32) * 0.1
    # weight_norm init: g = ||v|| per output channel (so w == v initially)
    g1 = jnp.sqrt(jnp.sum(v1 * v1, axis=(1, 2), keepdims=True))
    g2 = jnp.sqrt(jnp.sum(v2 * v2, axis=(1, 2), keepdims=True))
    b1 = jax.random.normal(ks[2], (n_outputs,), jnp.float32) * 0.05
    b2 = jax.random.normal(ks[3], (n_outputs,), jnp.float32) * 0.05
    params = dict(v1=v1, g1=g1, b1=b1, v2=v2, g2=g2, b2=b2)
    if n_inputs != n_outputs:
        params["w_ds"] = jax.random.normal(ks[4], (n_outputs, n_inputs, 1),
                                           jnp.float32) * 0.1
        params["b_ds"] = jax.random.normal(ks[5], (n_outputs,),
                                           jnp.float32) * 0.05
    return params


# --------------------------------- reference -------------------------------- #

def _reference_forward(x_ncl, params, *, dilation, padding):
    """Pure-JAX reference using lax.conv_general_dilated (mirrors PyTorch)."""
    def conv(x, w, b, dil, pad):
        y = lax.conv_general_dilated(
            x, w, window_strides=(1,), padding=[(pad, 0)],
            rhs_dilation=(dil,), dimension_numbers=("NCH", "OIH", "NCH"))
        return y + b[None, :, None]

    w1 = _weight_norm(params["v1"], params["g1"])
    w2 = _weight_norm(params["v2"], params["g2"])
    y1 = jax.nn.relu(conv(x_ncl, w1, params["b1"], dilation, padding))
    y2 = jax.nn.relu(conv(y1, w2, params["b2"], dilation, padding))
    if "w_ds" in params:
        res = conv(x_ncl, params["w_ds"], params["b_ds"], 1, 0)
    else:
        res = x_ncl
    return jax.nn.relu(y2 + res)


# ----------------------------------- main ----------------------------------- #

if __name__ == "__main__":
    key = jax.random.PRNGKey(0)
    k_x, k_p1, k_p2, k_x2, k_p3 = jax.random.split(key, 5)

    # Config A: standard TCN block, padding = (K-1)*dilation (causal, same len).
    B, C_in, C_out, L = 2, 4, 8, 16
    kernel_size, stride, dilation = 3, 1, 2
    padding = (kernel_size - 1) * dilation

    x = jax.random.normal(k_x, (B, C_in, L), jnp.float32)
    params1 = init_temporal_block_params(k_p1, C_in, C_out, kernel_size)
    ref1 = _reference_forward(x, params1, dilation=dilation, padding=padding)

    # 1) channel-changing block (fused 1x1 downsample), single L-tile
    out1 = temporal_block_forward(x, params1, kernel_size=kernel_size,
                                  stride=stride, dilation=dilation,
                                  padding=padding)
    out1 = jax.block_until_ready(out1)
    assert out1.shape == (B, C_out, L), out1.shape
    assert jnp.allclose(out1, ref1, atol=1e-5, rtol=1e-5), (
        float(jnp.max(jnp.abs(out1 - ref1))))

    # 2) same block forced onto multiple L-tiles (halo DMA + prefetch pipeline)
    out1t = temporal_block_forward(x, params1, kernel_size=kernel_size,
                                   stride=stride, dilation=dilation,
                                   padding=padding, tile_l=8)
    out1t = jax.block_until_ready(out1t)
    assert jnp.allclose(out1t, ref1, atol=1e-5, rtol=1e-5), (
        float(jnp.max(jnp.abs(out1t - ref1))))

    # 3) identity-residual block (C_in == C_out), stacked on out1
    params2 = init_temporal_block_params(k_p2, C_out, C_out, kernel_size)
    out2 = temporal_block_forward(out1, params2, kernel_size=kernel_size,
                                  stride=stride, dilation=dilation,
                                  padding=padding)
    out2 = jax.block_until_ready(out2)
    ref2 = _reference_forward(out1, params2, dilation=dilation, padding=padding)
    assert jnp.allclose(out2, ref2, atol=1e-5, rtol=1e-5), (
        float(jnp.max(jnp.abs(out2 - ref2))))

    # 4) longer sequence, dilation=1 (sublane-misaligned taps), 4 L-tiles
    B2, C_in2, C_out2, L2, d2 = 2, 8, 16, 80, 1
    pad2 = (kernel_size - 1) * d2
    x2 = jax.random.normal(k_x2, (B2, C_in2, L2), jnp.float32)
    params3 = init_temporal_block_params(k_p3, C_in2, C_out2, kernel_size)
    ref3 = _reference_forward(x2, params3, dilation=d2, padding=pad2)
    out3 = temporal_block_forward(x2, params3, kernel_size=kernel_size,
                                  stride=stride, dilation=d2, padding=pad2,
                                  tile_l=24)
    out3 = jax.block_until_ready(out3)
    assert jnp.allclose(out3, ref3, atol=1e-5, rtol=1e-5), (
        float(jnp.max(jnp.abs(out3 - ref3))))

    # 5) bf16 storage / f32 accumulation path (halved HBM + VMEM traffic)
    out1b = temporal_block_forward(x, params1, kernel_size=kernel_size,
                                   stride=stride, dilation=dilation,
                                   padding=padding, dtype=jnp.bfloat16)
    out1b = jax.block_until_ready(out1b)
    assert jnp.allclose(out1b.astype(jnp.float32), ref1, atol=1e-1, rtol=1e-1), (
        float(jnp.max(jnp.abs(out1b.astype(jnp.float32) - ref1))))

    print("KERNEL_OK")
</pallas_src>

<mosaic_0001>
module attributes {stable_mosaic.version = 11 : i64} {
  func.func @_tcn_block_kernel(%arg0: i32, %arg1: i32, %arg2: memref<48x128xf32, #tpu.memory_space<any>>, %arg3: memref<384x128xf32, #tpu.memory_space<vmem>>, %arg4: memref<1x128xf32, #tpu.memory_space<vmem>>, %arg5: memref<384x128xf32, #tpu.memory_space<vmem>>, %arg6: memref<1x128xf32, #tpu.memory_space<vmem>>, %arg7: memref<128x128xf32, #tpu.memory_space<vmem>>, %arg8: memref<1x128xf32, #tpu.memory_space<vmem>>, %arg9: memref<16x128xf32, #tpu.memory_space<vmem>>, %arg10: memref<2x24x128xf32, #tpu.memory_space<vmem>>, %arg11: memref<20x128xf32, #tpu.memory_space<vmem>>, %arg12: memref<2x!tpu.dma_semaphore, #tpu.memory_space<semaphore_mem>>) attributes {dimension_semantics = [#tpu.dimension_semantics<parallel>, #tpu.dimension_semantics<arbitrary>], iteration_bounds = array<i64: 2, 1>, scalar_prefetch = 0 : i64, scratch_operands = 3 : i64, tpu.core_type = #tpu.core_type<tc>, window_params = [{}, {pipeline_mode = #tpu.pipeline_mode<synchronous>, transform_indices = @transform_1, window_bounds = array<i64: 384, 128>}, {pipeline_mode = #tpu.pipeline_mode<synchronous>, transform_indices = @transform_2, window_bounds = array<i64: 1, 128>}, {pipeline_mode = #tpu.pipeline_mode<synchronous>, transform_indices = @transform_3, window_bounds = array<i64: 384, 128>}, {pipeline_mode = #tpu.pipeline_mode<synchronous>, transform_indices = @transform_4, window_bounds = array<i64: 1, 128>}, {pipeline_mode = #tpu.pipeline_mode<synchronous>, transform_indices = @transform_5, window_bounds = array<i64: 128, 128>}, {pipeline_mode = #tpu.pipeline_mode<synchronous>, transform_indices = @transform_6, window_bounds = array<i64: 1, 128>}, {transform_indices = @transform_7, window_bounds = array<i64: 16, 128>}]} {
    %c2_i32 = arith.constant 2 : i32
    %c0_i32 = arith.constant 0 : i32
    %0 = arith.cmpi eq, %c2_i32, %c0_i32 : i32
    %c1_i32 = arith.constant 1 : i32
    %1 = arith.select %0, %c1_i32, %c2_i32 : i32
    %2 = arith.remsi %arg1, %1 : i32
    %c0_i32_0 = arith.constant 0 : i32
    %3 = arith.cmpi ne, %2, %c0_i32_0 : i32
    %c0_i32_1 = arith.constant 0 : i32
    %4 = arith.cmpi slt, %2, %c0_i32_1 : i32
    %c0_i32_2 = arith.constant 0 : i32
    %5 = arith.cmpi slt, %1, %c0_i32_2 : i32
    %6 = arith.xori %4, %5 : i1
    %7 = arith.andi %6, %3 : i1
    %8 = arith.addi %2, %1 : i32
    %9 = arith.select %7, %8, %2 : i32
    %c24_i32 = arith.constant 24 : i32
    %10 = arith.muli %arg0, %c24_i32 : i32
    %c0_i32_3 = arith.constant 0 : i32
    %11 = arith.cmpi eq, %arg1, %c0_i32_3 : i32
    %12 = arith.extui %11 : i1 to i32
    %c0_i32_4 = arith.constant 0 : i32
    %13 = arith.cmpi ne, %12, %c0_i32_4 : i32
    scf.if %13 {
      %c0_i32_54 = arith.constant 0 : i32
      %78 = arith.addi %10, %c0_i32_54 : i32
      %c0_i32_55 = arith.constant 0 : i32
      %c0_i32_56 = arith.constant 0 : i32
      %c0_i32_57 = arith.constant 0 : i32
      %79 = tpu.memref_slice %arg2[%78, %c0_i32_57] : memref<48x128xf32, #tpu.memory_space<any>> -> memref<24x128xf32, #tpu.memory_space<any>>
      %c0_i32_58 = arith.constant 0 : i32
      %c0_i32_59 = arith.constant 0 : i32
      %80 = tpu.memref_slice %arg10[%c0_i32_55, %c0_i32_58, %c0_i32_59] : memref<2x24x128xf32, #tpu.memory_space<vmem>> -> memref<1x24x128xf32, #tpu.memory_space<vmem>>
      %81 = tpu.memref_squeeze %80 : memref<1x24x128xf32, #tpu.memory_space<vmem>> -> memref<24x128xf32, #tpu.memory_space<vmem>>
      %82 = tpu.memref_slice %arg12[%c0_i32_56] : memref<2x!tpu.dma_semaphore, #tpu.memory_space<semaphore_mem>> -> memref<1x!tpu.dma_semaphore, #tpu.memory_space<semaphore_mem>>
      %83 = tpu.memref_squeeze %82 : memref<1x!tpu.dma_semaphore, #tpu.memory_space<semaphore_mem>> -> memref<!tpu.dma_semaphore, #tpu.memory_space<semaphore_mem>>
      tpu.enqueue_dma source(%79 : memref<24x128xf32, #tpu.memory_space<any>>) target(%81 : memref<24x128xf32, #tpu.memory_space<vmem>>) target_semaphore(%83 : memref<!tpu.dma_semaphore, #tpu.memory_space<semaphore_mem>>)
    } else {
    }
    %c0_i32_5 = arith.constant 0 : i32
    %c0_i32_6 = arith.constant 0 : i32
    %14 = tpu.memref_slice %arg2[%c0_i32_5, %c0_i32_6] : memref<48x128xf32, #tpu.memory_space<any>> -> memref<24x128xf32, #tpu.memory_space<any>>
    %c0_i32_7 = arith.constant 0 : i32
    %c0_i32_8 = arith.constant 0 : i32
    %15 = tpu.memref_slice %arg10[%9, %c0_i32_7, %c0_i32_8] : memref<2x24x128xf32, #tpu.memory_space<vmem>> -> memref<1x24x128xf32, #tpu.memory_space<vmem>>
    %16 = tpu.memref_squeeze %15 : memref<1x24x128xf32, #tpu.memory_space<vmem>> -> memref<24x128xf32, #tpu.memory_space<vmem>>
    %17 = tpu.memref_slice %arg12[%9] : memref<2x!tpu.dma_semaphore, #tpu.memory_space<semaphore_mem>> -> memref<1x!tpu.dma_semaphore, #tpu.memory_space<semaphore_mem>>
    %18 = tpu.memref_squeeze %17 : memref<1x!tpu.dma_semaphore, #tpu.memory_space<semaphore_mem>> -> memref<!tpu.dma_semaphore, #tpu.memory_space<semaphore_mem>>
    tpu.wait_dma2 semaphore(%18 : memref<!tpu.dma_semaphore, #tpu.memory_space<semaphore_mem>>) src(%14 : memref<24x128xf32, #tpu.memory_space<any>>) dst(%16 : memref<24x128xf32, #tpu.memory_space<vmem>>)
    %c1_i32_9 = arith.constant 1 : i32
    %19 = arith.addi %arg1, %c1_i32_9 : i32
    %c1_i32_10 = arith.constant 1 : i32
    %20 = arith.cmpi slt, %19, %c1_i32_10 : i32
    %21 = arith.extui %20 : i1 to i32
    %c0_i32_11 = arith.constant 0 : i32
    %22 = arith.cmpi ne, %21, %c0_i32_11 : i32
    scf.if %22 {
      %c1_i32_54 = arith.constant 1 : i32
      %78 = arith.addi %arg1, %c1_i32_54 : i32
      %c1_i32_55 = arith.constant 1 : i32
      %79 = arith.subi %c1_i32_55, %9 : i32
      %c16_i32_56 = arith.constant 16 : i32
      %80 = arith.muli %78, %c16_i32_56 : i32
      %81 = arith.addi %10, %80 : i32
      %c0_i32_57 = arith.constant 0 : i32
      %82 = tpu.memref_slice %arg2[%81, %c0_i32_57] : memref<48x128xf32, #tpu.memory_space<any>> -> memref<24x128xf32, #tpu.memory_space<any>>
      %c0_i32_58 = arith.constant 0 : i32
      %c0_i32_59 = arith.constant 0 : i32
      %83 = tpu.memref_slice %arg10[%79, %c0_i32_58, %c0_i32_59] : memref<2x24x128xf32, #tpu.memory_space<vmem>> -> memref<1x24x128xf32, #tpu.memory_space<vmem>>
      %84 = tpu.memref_squeeze %83 : memref<1x24x128xf32, #tpu.memory_space<vmem>> -> memref<24x128xf32, #tpu.memory_space<vmem>>
      %85 = tpu.memref_slice %arg12[%79] : memref<2x!tpu.dma_semaphore, #tpu.memory_space<semaphore_mem>> -> memref<1x!tpu.dma_semaphore, #tpu.memory_space<semaphore_mem>>
      %86 = tpu.memref_squeeze %85 : memref<1x!tpu.dma_semaphore, #tpu.memory_space<semaphore_mem>> -> memref<!tpu.dma_semaphore, #tpu.memory_space<semaphore_mem>>
      tpu.enqueue_dma source(%82 : memref<24x128xf32, #tpu.memory_space<any>>) target(%84 : memref<24x128xf32, #tpu.memory_space<vmem>>) target_semaphore(%86 : memref<!tpu.dma_semaphore, #tpu.memory_space<semaphore_mem>>)
    } else {
    }
    %23 = arith.index_cast %9 : i32 to index
    %c0 = arith.constant 0 : index
    %c0_12 = arith.constant 0 : index
    %24 = vector.load %arg10[%23, %c0, %c0_12] : memref<2x24x128xf32, #tpu.memory_space<vmem>>, vector<1x20x128xf32>
    %25 = vector.shape_cast %24 : vector<1x20x128xf32> to vector<20x128xf32>
    %c0_13 = arith.constant 0 : index
    %c0_14 = arith.constant 0 : index
    %26 = vector.load %arg3[%c0_13, %c0_14] : memref<384x128xf32, #tpu.memory_space<vmem>>, vector<128x128xf32>
    %cst = arith.constant dense<0.000000e+00> : vector<20x128xf32>
    %27 = tpu.matmul %25, %26, %cst {dimension_numbers = #tpu.dot_dimension_numbers<[1], [0], [0], [1], [0, 0, 1, 1], [], []>} : vector<20x128xf32>, vector<128x128xf32>, vector<20x128xf32> -> vector<20x128xf32>
    %28 = arith.index_cast %9 : i32 to index
    %c2 = arith.constant 2 : index
    %c0_15 = arith.constant 0 : index
    %29 = vector.load %arg10[%28, %c2, %c0_15] : memref<2x24x128xf32, #tpu.memory_space<vmem>>, vector<1x20x128xf32>
    %30 = vector.shape_cast %29 : vector<1x20x128xf32> to vector<20x128xf32>
    %c128 = arith.constant 128 : index
    %c0_16 = arith.constant 0 : index
    %31 = vector.load %arg3[%c128, %c0_16] : memref<384x128xf32, #tpu.memory_space<vmem>>, vector<128x128xf32>
    %cst_17 = arith.constant dense<0.000000e+00> : vector<20x128xf32>
    %32 = tpu.matmul %30, %31, %cst_17 {dimension_numbers = #tpu.dot_dimension_numbers<[1], [0], [0], [1], [0, 0, 1, 1], [], []>} : vector<20x128xf32>, vector<128x128xf32>, vector<20x128xf32> -> vector<20x128xf32>
    %33 = arith.addf %27, %32 : vector<20x128xf32>
    %34 = arith.index_cast %9 : i32 to index
    %c4 = arith.constant 4 : index
    %c0_18 = arith.constant 0 : index
    %35 = vector.load %arg10[%34, %c4, %c0_18] : memref<2x24x128xf32, #tpu.memory_space<vmem>>, vector<1x20x128xf32>
    %36 = vector.shape_cast %35 : vector<1x20x128xf32> to vector<20x128xf32>
    %c256 = arith.constant 256 : index
    %c0_19 = arith.constant 0 : index
    %37 = vector.load %arg3[%c256, %c0_19] : memref<384x128xf32, #tpu.memory_space<vmem>>, vector<128x128xf32>
    %cst_20 = arith.constant dense<0.000000e+00> : vector<20x128xf32>
    %38 = tpu.matmul %36, %37, %cst_20 {dimension_numbers = #tpu.dot_dimension_numbers<[1], [0], [0], [1], [0, 0, 1, 1], [], []>} : vector<20x128xf32>, vector<128x128xf32>, vector<20x128xf32> -> vector<20x128xf32>
    %39 = arith.addf %33, %38 : vector<20x128xf32>
    %c0_21 = arith.constant 0 : index
    %c0_22 = arith.constant 0 : index
    %40 = vector.load %arg4[%c0_21, %c0_22] : memref<1x128xf32, #tpu.memory_space<vmem>>, vector<1x128xf32>
    %41 = vector.broadcast %40 : vector<1x128xf32> to vector<20x128xf32>
    %42 = arith.addf %39, %41 : vector<20x128xf32>
    %cst_23 = arith.constant 0.000000e+00 : f32
    %43 = vector.broadcast %cst_23 : f32 to vector<20x128xf32>
    %44 = arith.maximumf %42, %43 : vector<20x128xf32>
    %c0_24 = arith.constant 0 : index
    %c0_25 = arith.constant 0 : index
    %45 = vector.load %arg11[%c0_24, %c0_25] : memref<20x128xf32, #tpu.memory_space<vmem>>, vector<20x128xf32>
    tpu.vector_store %arg11[%c0_24, %c0_25], %44 {strides = array<i32>} : memref<20x128xf32, #tpu.memory_space<vmem>>, vector<20x128xf32>,
    %c16_i32 = arith.constant 16 : i32
    %46 = arith.muli %arg1, %c16_i32 : i32
    %c4_i32 = arith.constant 4 : i32
    %47 = arith.cmpi slt, %46, %c4_i32 : i32
    %48 = arith.extui %47 : i1 to i32
    %c0_i32_26 = arith.constant 0 : i32
    %49 = arith.cmpi ne, %48, %c0_i32_26 : i32
    scf.if %49 {
      %c16_i32_54 = arith.constant 16 : i32
      %78 = arith.muli %arg1, %c16_i32_54 : i32
      %c4_i32_55 = arith.constant 4 : i32
      %79 = arith.subi %78, %c4_i32_55 : i32
      %80 = tpu.iota {dimensions = array<i32: 0>} : vector<20x1xi32>
      %81 = vector.broadcast %79 : i32 to vector<20x1xi32>
      %82 = arith.addi %81, %80 : vector<20x1xi32>
      %c0_i32_56 = arith.constant 0 : i32
      %83 = vector.broadcast %c0_i32_56 : i32 to vector<20x1xi32>
      %84 = arith.cmpi sge, %82, %83 : vector<20x1xi32>
      %c0_57 = arith.constant 0 : index
      %c0_58 = arith.constant 0 : index
      %85 = vector.load %arg11[%c0_57, %c0_58] : memref<20x128xf32, #tpu.memory_space<vmem>>, vector<20x128xf32>
      %c0_i32_59 = arith.constant 0 : i32
      %86 = arith.sitofp %c0_i32_59 : i32 to f32
      %87 = vector.shape_cast %84 : vector<20x1xi1> to vector<20x1xi1>
      %88 = vector.broadcast %87 : vector<20x1xi1> to vector<20x128xi1>
      %89 = vector.broadcast %86 : f32 to vector<20x128xf32>
      %90 = arith.select %88, %85, %89 : vector<20x128xi1>, vector<20x128xf32>
      %c0_60 = arith.constant 0 : index
      %c0_61 = arith.constant 0 : index
      %91 = vector.load %arg11[%c0_60, %c0_61] : memref<20x128xf32, #tpu.memory_space<vmem>>, vector<20x128xf32>
      tpu.vector_store %arg11[%c0_60, %c0_61], %90 {strides = array<i32>} : memref<20x128xf32, #tpu.memory_space<vmem>>, vector<20x128xf32>,
    } else {
    }
    %c0_27 = arith.constant 0 : index
    %c0_28 = arith.constant 0 : index
    %50 = vector.load %arg11[%c0_27, %c0_28] : memref<20x128xf32, #tpu.memory_space<vmem>>, vector<16x128xf32>
    %c0_29 = arith.constant 0 : index
    %c0_30 = arith.constant 0 : index
    %51 = vector.load %arg5[%c0_29, %c0_30] : memref<384x128xf32, #tpu.memory_space<vmem>>, vector<128x128xf32>
    %cst_31 = arith.constant dense<0.000000e+00> : vector<16x128xf32>
    %52 = tpu.matmul %50, %51, %cst_31 {dimension_numbers = #tpu.dot_dimension_numbers<[1], [0], [0], [1], [0, 0, 1, 1], [], []>} : vector<16x128xf32>, vector<128x128xf32>, vector<16x128xf32> -> vector<16x128xf32>
    %c2_32 = arith.constant 2 : index
    %c0_33 = arith.constant 0 : index
    %53 = vector.load %arg11[%c2_32, %c0_33] : memref<20x128xf32, #tpu.memory_space<vmem>>, vector<16x128xf32>
    %c128_34 = arith.constant 128 : index
    %c0_35 = arith.constant 0 : index
    %54 = vector.load %arg5[%c128_34, %c0_35] : memref<384x128xf32, #tpu.memory_space<vmem>>, vector<128x128xf32>
    %cst_36 = arith.constant dense<0.000000e+00> : vector<16x128xf32>
    %55 = tpu.matmul %53, %54, %cst_36 {dimension_numbers = #tpu.dot_dimension_numbers<[1], [0], [0], [1], [0, 0, 1, 1], [], []>} : vector<16x128xf32>, vector<128x128xf32>, vector<16x128xf32> -> vector<16x128xf32>
    %56 = arith.addf %52, %55 : vector<16x128xf32>
    %c4_37 = arith.constant 4 : index
    %c0_38 = arith.constant 0 : index
    %57 = vector.load %arg11[%c4_37, %c0_38] : memref<20x128xf32, #tpu.memory_space<vmem>>, vector<16x128xf32>
    %c256_39 = arith.constant 256 : index
    %c0_40 = arith.constant 0 : index
    %58 = vector.load %arg5[%c256_39, %c0_40] : memref<384x128xf32, #tpu.memory_space<vmem>>, vector<128x128xf32>
    %cst_41 = arith.constant dense<0.000000e+00> : vector<16x128xf32>
    %59 = tpu.matmul %57, %58, %cst_41 {dimension_numbers = #tpu.dot_dimension_numbers<[1], [0], [0], [1], [0, 0, 1, 1], [], []>} : vector<16x128xf32>, vector<128x128xf32>, vector<16x128xf32> -> vector<16x128xf32>
    %60 = arith.addf %56, %59 : vector<16x128xf32>
    %c0_42 = arith.constant 0 : index
    %c0_43 = arith.constant 0 : index
    %61 = vector.load %arg6[%c0_42, %c0_43] : memref<1x128xf32, #tpu.memory_space<vmem>>, vector<1x128xf32>
    %62 = vector.broadcast %61 : vector<1x128xf32> to vector<16x128xf32>
    %63 = arith.addf %60, %62 : vector<16x128xf32>
    %cst_44 = arith.constant 0.000000e+00 : f32
    %64 = vector.broadcast %cst_44 : f32 to vector<16x128xf32>
    %65 = arith.maximumf %63, %64 : vector<16x128xf32>
    %66 = arith.index_cast %9 : i32 to index
    %c8 = arith.constant 8 : index
    %c0_45 = arith.constant 0 : index
    %67 = vector.load %arg10[%66, %c8, %c0_45] : memref<2x24x128xf32, #tpu.memory_space<vmem>>, vector<1x16x128xf32>
    %68 = vector.shape_cast %67 : vector<1x16x128xf32> to vector<16x128xf32>
    %c0_46 = arith.constant 0 : index
    %c0_47 = arith.constant 0 : index
    %69 = vector.load %arg7[%c0_46, %c0_47] : memref<128x128xf32, #tpu.memory_space<vmem>>, vector<128x128xf32>
    %cst_48 = arith.constant dense<0.000000e+00> : vector<16x128xf32>
    %70 = tpu.matmul %68, %69, %cst_48 {dimension_numbers = #tpu.dot_dimension_numbers<[1], [0], [0], [1], [0, 0, 1, 1], [], []>} : vector<16x128xf32>, vector<128x128xf32>, vector<16x128xf32> -> vector<16x128xf32>
    %c0_49 = arith.constant 0 : index
    %c0_50 = arith.constant 0 : index
    %71 = vector.load %arg8[%c0_49, %c0_50] : memref<1x128xf32, #tpu.memory_space<vmem>>, vector<1x128xf32>
    %72 = vector.broadcast %71 : vector<1x128xf32> to vector<16x128xf32>
    %73 = arith.addf %70, %72 : vector<16x128xf32>
    %74 = arith.addf %65, %73 : vector<16x128xf32>
    %cst_51 = arith.constant 0.000000e+00 : f32
    %75 = vector.broadcast %cst_51 : f32 to vector<16x128xf32>
    %76 = arith.maximumf %74, %75 : vector<16x128xf32>
    %c0_52 = arith.constant 0 : index
    %c0_53 = arith.constant 0 : index
    %77 = vector.load %arg9[%c0_52, %c0_53] : memref<16x128xf32, #tpu.memory_space<vmem>>, vector<16x128xf32>
    tpu.vector_store %arg9[%c0_52, %c0_53], %76 {strides = array<i32>} : memref<16x128xf32, #tpu.memory_space<vmem>>, vector<16x128xf32>,
    return
  }
  func.func @transform_1(%arg0: i32, %arg1: i32) -> (i32, i32) {
    %c0_i32 = arith.constant 0 : i32
    %c0_i32_0 = arith.constant 0 : i32
    %c0_i32_1 = arith.constant 0 : i32
    return %c0_i32, %c0_i32_0 : i32, i32
  }
  func.func @transform_2(%arg0: i32, %arg1: i32) -> (i32, i32) {
    %c0_i32 = arith.constant 0 : i32
    %c0_i32_0 = arith.constant 0 : i32
    %c0_i32_1 = arith.constant 0 : i32
    return %c0_i32, %c0_i32_0 : i32, i32
  }
  func.func @transform_3(%arg0: i32, %arg1: i32) -> (i32, i32) {
    %c0_i32 = arith.constant 0 : i32
    %c0_i32_0 = arith.constant 0 : i32
    %c0_i32_1 = arith.constant 0 : i32
    return %c0_i32, %c0_i32_0 : i32, i32
  }
  func.func @transform_4(%arg0: i32, %arg1: i32) -> (i32, i32) {
    %c0_i32 = arith.constant 0 : i32
    %c0_i32_0 = arith.constant 0 : i32
    %c0_i32_1 = arith.constant 0 : i32
    return %c0_i32, %c0_i32_0 : i32, i32
  }
  func.func @transform_5(%arg0: i32, %arg1: i32) -> (i32, i32) {
    %c0_i32 = arith.constant 0 : i32
    %c0_i32_0 = arith.constant 0 : i32
    %c0_i32_1 = arith.constant 0 : i32
    return %c0_i32, %c0_i32_0 : i32, i32
  }
  func.func @transform_6(%arg0: i32, %arg1: i32) -> (i32, i32) {
    %c0_i32 = arith.constant 0 : i32
    %c0_i32_0 = arith.constant 0 : i32
    %c0_i32_1 = arith.constant 0 : i32
    return %c0_i32, %c0_i32_0 : i32, i32
  }
  func.func @transform_7(%arg0: i32, %arg1: i32) -> (i32, i32) {
    %c1_i32 = arith.constant 1 : i32
    %0 = arith.muli %arg0, %c1_i32 : i32
    %1 = arith.addi %0, %arg1 : i32
    %c0_i32 = arith.constant 0 : i32
    %c0_i32_0 = arith.constant 0 : i32
    return %1, %c0_i32 : i32, i32
  }
}

</mosaic_0001>

<bundles_post_ra>
// kernel: tpu_custom_call.1
= control target key start
LH: loop header
LB: loop body
LE: loop exit
PB: predicated region body
PF: predicated region fallthrough
CT: control target
= control target key end

     0   :  { %s2476_s0 = inlined_call_operand.hbm [shape: f32[48,128], index: 0, kind: input, shape index: {}]   ;;  %s2477_s1 = inlined_call_operand.hbm [shape: f32[384,128], index: 1, kind: input, shape index: {}]   ;;  %s2478_s2 = inlined_call_operand.vmem [shape: f32[1,128], index: 2, kind: input, shape index: {}]   ;;  %s2479_s3 = inlined_call_operand.hbm [shape: f32[384,128], index: 3, kind: input, shape index: {}]   ;;  %s2480_s4 = inlined_call_operand.vmem [shape: f32[1,128], index: 4, kind: input, shape index: {}]   ;;  %s2481_s5 = inlined_call_operand.hbm [shape: f32[128,128], index: 5, kind: input, shape index: {}]   ;;  %s2482_s6 = inlined_call_operand.vmem [shape: f32[1,128], index: 6, kind: input, shape index: {}]   ;;  %s2483_s7 = inlined_call_operand.hbm [shape: f32[32,128], index: 7, kind: output, shape index: {}]  }
   0x1   :  { %2491 = sst [smem:[#allocation26_spill]] %s2479_s3 }
   0x2   :  { %12 = vsyncpa [#allocation6], 0 }
   0x3   :  { %13 = vsyncpa [#allocation9], 0 }
   0x4   :  { %14 = vsyncpa [#allocation7], 0 }
   0x5   :  { %16 = vsyncpa [#allocation7 + $0x1], 0  ;;  %s2195_s24 = smov 0   ;;  %s2197_s25 = smov 0  }
   0x6   :  { %s2199_s26 = smov 0   ;;  %s2201_s27 = smov 0  }
   0x7   :  { %s2203_s28 = smov 0   ;;  %s2205_s29 = smov 0  }
   0x8 LB: > { %2492 = sst [smem:[#allocation22_spill]] %s2129_s26  ;;  %s1229_s30 = sadd.s32 4294967295, %s2141_s29   ;;  %s2141_s29 = sphi %s2205_s29, %s22_s29   ;;  %s2137_s28 = sphi %s2203_s28, %s2510_s28   ;;  %s2133_s27 = sphi %s2201_s27, %s2509_s27   ;;  %s2129_s26 = sphi %s2199_s26, %s2508_s26   ;;  %s2125_s25 = sphi %s2197_s25, %s2512_s25   ;;  %s2121_s24 = sphi %s2195_s24, %s2511_s24  }
   0x9   : > { %2493 = sst [smem:[#allocation23_spill]] %s2137_s28  ;;  %s1230_s8 = sadd.s32 4294967294, %s2141_s29  }
   0xa   : > { %s34_s9 = sadd.s32 1, %s2137_s28  ;;  %s169_s10 = sadd.s32 1, %s2129_s26 }
   0xb   : > { %p36_p0 = scmp.ge.s32.totalorder %s34_s9, 2  ;;  %p179_p1 = scmp.ne.s32.totalorder %s2129_s26, %s2125_s25 }
   0xc   : > { %p180_p2 = scmp.eq.s32.totalorder %s1229_s30, 1  ;;  %p185_p3 = scmp.ne.s32.totalorder %s2125_s25, %s2121_s24 }
   0xd   : > { %s2514_s9 = smov (%p36_p0, %s34_s9), 0  ;;  %p186_p5 = scmp.eq.s32.totalorder %s1230_s8, 1 }
   0xe   : > { %2494 = sst [smem:[#allocation24_spill]] %s2514_s9  ;;  %p2235_p4 = por %p180_p2, %p179_p1 }
   0xf   : > { %s166_s12 = ssub.s32 %s2137_s28, %s2514_s9  ;;  %p1231_p6 = scmp.ge.s32.totalorder %s2141_s29, 1 }
  0x10   : > { %s2495_s11 = scalar_select %p2235_p4, 1, 0 }
  0x11   : > { %p167_p7 = scmp.eq.s32.totalorder %s166_s12, 0  ;;  %p2242_p8 = por %p186_p5, %p185_p3 }
  0x12   : > { %p193_p9 = scmp.lt.s32.totalorder %s2141_s29, 3  ;;  %p2254_p11 = scmp.eq.s32.totalorder %s1229_s30, 0 }
  0x13   : > { %s2496_s13 = scalar_select %p2242_p8, 1, 0 }
  0x14   : > { %s2248_s14 = scalar_select %p167_p7, %s2129_s26, %s169_s10  }
  0x15   : > { %p2250_p10 = pnand %p1231_p6, %p193_p9  ;;  %s2143_s17 = smov [#allocation8]  }
  0x16   : > { %2497 = sst [smem:[#allocation25_spill]] %s2248_s14  ;;  %s221_s18 = sshll.u32 %s2143_s17, 4  ;;  %s222_s18 = int_to_ptr.vmem [resolvable:$true] %s221_s18 }
  0x17   : > { %s2498_s15 = scalar_select %p2250_p10, 1, 0 }
  0x18   : > { %s2499_s16 = scalar_select %p2254_p11, 1, 0 }
  0x19   : > { %p1864_p12 = pneg %p2250_p10  ;;  %s2144_s20 = smov [#allocation5]  }
  0x1a   : > { %s205_s21 = sshll.u32 %s2144_s20, 4  ;;  %s2501_s3 = sld [smem:[#allocation26_spill]]  ;;  %s206_s21 = int_to_ptr.vmem [resolvable:$true] %s205_s21 }
  0x1b   : > { %p2262_p13 = pnand %p2254_p11, %p1864_p12 }
  0x1d   : > { %p2274_p1 = pneg %p2262_p13 }
  0x20   : > { %s1945_s30 = scalar_lea.hbm %s2501_s3, 6144 }
  0x21   : > { %p1946_p0 = scmp.ne.s32.totalorder %s2501_s3, %s1945_s30  ;;  %p1952_p5 = scmp.lt.u32.totalorder %s1945_s30, %s2501_s3 }
  0x23   : > { %p1948_p2 = pnand %p2274_p1, %p1946_p0 }
  0x25   : > { %p1949_p3 = pneg %p1948_p2 }
  0x27   : > { %p1954_p6 = pnand %p1952_p5, %p1949_p3 }
  0x29   : > { %1957 = shalt.err (!%p1954_p6)
}
  0x2a   : > { %s1958_s20 = scalar_lea.vmem %s222_s18, 6144  ;;  %p1966_p8 = scmp.lt.s32.totalorder %s222_s18, %s222_s18 }
  0x2b   : > { %p1959_p7 = scmp.ne.s32.totalorder %s222_s18, %s1958_s20  ;;  %p1967_p4 = scmp.lt.s32.totalorder %s1958_s20, %s1958_s20 }
  0x2d   : > { %p1961_p9 = pnand %p1959_p7, %p2274_p1  ;;  %p1968_p11 = por %p1967_p4, %p1966_p8 }
  0x2f   : > { %p1962_p12 = pneg %p1961_p9 }
  0x31   : > { %p1969_p10 = pnand %p1968_p11, %p1962_p12 }
  0x33   : > { %1972 = shalt.err (!%p1969_p10)
}
  0x34   : > { %s2145_s22 = smov 128   ;;  %s2146_s23 = smov 8  }
  0x35   : > { %1870 = dma.hbm_to_vmem [thread:$0]  (!%p2262_p13), %s2501_s3, 6144, %s222_s18, [#allocation9], %s2145_s22, %s2145_s22, %s2146_s23  }
  0x36   : > { %s1973_s17 = scalar_lea.hbm %s2477_s1, 6144 }
  0x37   : > { %p1974_p4 = scmp.ne.s32.totalorder %s2477_s1, %s1973_s17  ;;  %p1980_p11 = scmp.lt.u32.totalorder %s1973_s17, %s2477_s1 }
  0x39   : > { %p1976_p8 = pnand %p1974_p4, %p2274_p1 }
  0x3b   : > { %p1977_p10 = pneg %p1976_p8 }
  0x3d   : > { %p1982_p0 = pnand %p1980_p11, %p1977_p10 }
  0x3f   : > { %1985 = shalt.err (!%p1982_p0)
}
  0x40   : > { %s1986_s9 = scalar_lea.vmem %s206_s21, 6144  ;;  %p1994_p6 = scmp.lt.s32.totalorder %s206_s21, %s206_s21 }
  0x41   : > { %p1987_p2 = scmp.ne.s32.totalorder %s206_s21, %s1986_s9  ;;  %p1995_p7 = scmp.lt.s32.totalorder %s1986_s9, %s1986_s9 }
  0x43   : > { %p1989_p3 = pnand %p1987_p2, %p2274_p1  ;;  %p1996_p9 = por %p1995_p7, %p1994_p6 }
  0x45   : > { %p1990_p5 = pneg %p1989_p3 }
  0x47   : > { %p1997_p12 = pnand %p1996_p9, %p1990_p5 }
  0x49   : > { %2000 = shalt.err (!%p1997_p12)
}
  0x4a   : > { %1867 = dma.hbm_to_vmem [thread:$0]  (!%p2262_p13), %s2477_s1, 6144, %s206_s21, [#allocation6], %s2145_s22, %s2145_s22, %s2146_s23  }
  0x4b   : > { %s2147_s14 = smov [#allocation10]   ;;  %s2001_s10 = scalar_lea.hbm %s2481_s5, 2048 }
  0x4c   : > { %s237_s18 = sshll.u32 %s2147_s14, 4  ;;  %p2002_p4 = scmp.ne.s32.totalorder %s2481_s5, %s2001_s10  ;;  %s238_s18 = int_to_ptr.vmem [resolvable:$true] %s237_s18 }
  0x4d   : > { %p2008_p11 = scmp.lt.u32.totalorder %s2001_s10, %s2481_s5 }
  0x4e   : > { %p2004_p8 = pnand %p2002_p4, %p2274_p1 }
  0x50   : > { %p2005_p10 = pneg %p2004_p8 }
  0x52   : > { %p2010_p0 = pnand %p2008_p11, %p2005_p10 }
  0x54   : > { %2013 = shalt.err (!%p2010_p0)
}
  0x55   : > { %s2014_s21 = scalar_lea.vmem %s238_s18, 2048  ;;  %p2022_p6 = scmp.lt.s32.totalorder %s238_s18, %s238_s18 }
  0x56   : > { %p2015_p2 = scmp.ne.s32.totalorder %s238_s18, %s2014_s21  ;;  %p2023_p7 = scmp.lt.s32.totalorder %s2014_s21, %s2014_s21 }
  0x58   : > { %p2017_p3 = pnand %p2015_p2, %p2274_p1  ;;  %p2024_p9 = por %p2023_p7, %p2022_p6 }
  0x5a   : > { %p2018_p5 = pneg %p2017_p3 }
  0x5c   : > { %p2025_p12 = pnand %p2024_p9, %p2018_p5 }
  0x5e   : > { %2028 = shalt.err (!%p2025_p12)
}
  0x5f   : > { %1873 = dma.hbm_to_vmem [thread:$0]  (!%p2262_p13), %s2481_s5, 2048, %s238_s18, [#allocation9], %s2145_s22, %s2145_s22, %s2146_s23  }
  0x60   : > { %p2503_p4 = scmp.ne.s32.totalorder %s2498_s15, 0 }
  0x61   : > { %p2504_p1 = scmp.ne.s32.totalorder (!%p2503_p4), %s2499_s16, 0 }
  0x62   : > { %256 = sbr.rel (%p2503_p4) target bundleno = 743 (0x2e7), region = 44 }
  0x69   : > { %2106 = dma.done.wait (%p2504_p1), [#allocation6], 6144  }
  0x6a   : > { %2108 = vsyncadd (%p2504_p1), [#allocation6], 4294961152 }
  0x6b   : > { %2110 = dma.done.wait (%p2504_p1), [#allocation9], 8192  }
  0x6c   : > { %2112 = vsyncadd (%p2504_p1), [#allocation9], 4294959104  ;;  %s286_s19 = sand.u32 1, %s2125_s25   ;;  %s1252_s12 = smul.u32 384, %s2133_s27 }
  0x6d   : > { %s1239_s15 = sshll.u32 %s286_s19, 4  ;;  %s2148_s14 = smov [#allocation2]  }
  0x6e   : > { %s309_s28 = scalar_lea.hbm %s2476_s0, %s1252_s12  ;;  %s317_s18 = sshll.u32 %s2148_s14, 4  ;;  %s318_s18 = int_to_ptr.vmem [resolvable:$true] %s317_s18 }
  0x6f   : > { %s2029_s30 = scalar_lea.hbm %s309_s28, 384  ;;  %s2031_s16 = scalar_lea.hbm %s2476_s0, 768 }
  0x70   : > { %p2030_p13 = scmp.ne.s32.totalorder %s309_s28, %s2029_s30  ;;  %p2032_p8 = scmp.lt.u32.totalorder %s309_s28, %s2476_s0 }
  0x71   : > { %p2033_p10 = scmp.lt.u32.totalorder %s2031_s16, %s2029_s30  ;;  %p2035_p0 = scmp.lt.u32.totalorder %s2029_s30, %s309_s28 }
  0x73   : > { %p2034_p11 = por %p2033_p10, %p2032_p8 }
  0x75   : > { %p2036_p2 = por %p2035_p0, %p2034_p11 }
  0x77   : > { %p2037_p3 = pnand %p2036_p2, %p2030_p13 }
  0x79   : > { %2040 = shalt.err (!%p2037_p3)  }
  0x7a   : > { %s2041_s9 = scalar_lea.vmem %s318_s18, 384  ;;  %s2045_s21 = scalar_lea.vmem %s318_s18, 768 }
  0x7b   : > { %p2042_p5 = scmp.ne.s32.totalorder %s318_s18, %s2041_s9  ;;  %p2046_p6 = scmp.lt.s32.totalorder %s318_s18, %s318_s18 }
  0x7c   : > { %p2047_p7 = scmp.lt.s32.totalorder %s2045_s21, %s2041_s9 }
  0x7e   : > { %p2048_p9 = por %p2047_p7, %p2046_p6 }
  0x80   : > { %p2049_p12 = pnand %p2048_p9, %p2042_p5 }
  0x82   : > { %2052 = shalt.err (!%p2049_p12)  }
  0x83   : > { %320 = dma.hbm_to_vmem [thread:$0]  %s309_s28, 384, %s318_s18, [#allocation4] }
  0x84   : > { %s2358_s3 = scalar_lea.vmem [#allocation11], %s1239_s15 }
  0x85   : > { %2113 = dma.done.wait [#allocation4], 384 }
  0x86   : > { %2114 = vsyncadd [#allocation4], 4294966912  ;;  %v2149_v0 = vmov 0.0|0.0   ;;  %vm2150_vm0 = vmmov 0   ;;  %v2151_v1 = vmov 0.0   ;;  %v373_v2 = vld [vmem:[#allocation5 + $0x80] sm:$0xff] }
  0x87   : > { %1646 = vmatprep.subr.bf16.mxu0 %v2149_v0  ;;  %1670 = vmatprep.subr.bf16.mxu1 %v2149_v0  ;;  %v374_v3 = vld [vmem:[#allocation5 + $0x88] sm:$0xff]  ;;  %v354_v4 = vld [vmem:[#allocation5] sm:$0xff]  ;;  %v375_v7 = vld [vmem:[#allocation5 + $0x90] sm:$0xff]  ;;  %s1253_s14 = sshll.u32 %s2133_s27, 8  ;;  %s1112_s18 = sshll.u32 %s2358_s3, 4  ;;  %s2424_s18 = int_to_ptr.vmem [resolvable:$true] %s1112_s18 }
  0x88   : > { %1415 = vmatprep.mubr.msk.f32.mxu0 %vm2150_vm0, %v2151_v1  ;;  %1456 = vmatprep.mubr.msk.f32.mxu1 %vm2150_vm0, %v2151_v1  ;;  %v1647_v5 = vpack.c.bf16 %v374_v3, %v373_v2  ;;  %v355_v6 = vld [vmem:[#allocation5 + $0x8] sm:$0xff]  ;;  %v376_v8 = vld [vmem:[#allocation5 + $0x98] sm:$0xff]  ;;  %v356_v10 = vld [vmem:[#allocation5 + $0x10] sm:$0xff]  ;;  %s2422_s10 = scalar_lea.hbm %s2483_s7, %s1253_s14  ;;  %s2430_s16 = scalar_lea.sflag [#allocation7], %s286_s19 }
  0x89   : > { %v1671_v9 = vpack.c.bf16 %v355_v6, %v354_v4  ;;  %v357_v11 = vld [vmem:[#allocation5 + $0x18] sm:$0xff]  ;;  %v1650_v12 = vpack.c.bf16 %v376_v8, %v375_v7  ;;  %v377_v14 = vld [vmem:[#allocation5 + $0xa0] sm:$0xff]  ;;  %v378_v15 = vld [vmem:[#allocation5 + $0xa8] sm:$0xff]  ;;  %s2053_s27 = scalar_lea.vmem %s2424_s18, 256  ;;  %p2505_p1 = scmp.ne.s32.totalorder %s2495_s11, 0 }
  0x8a   : > { %1648 = vmatpush3.bf16.msra.mxu0 %v1647_v5  ;;  %v1674_v13 = vpack.c.bf16 %v357_v11, %v356_v10  ;;  %v358_v16 = vld [vmem:[#allocation5 + $0x20] sm:$0xff]  ;;  %v359_v17 = vld [vmem:[#allocation5 + $0x28] sm:$0xff]  ;;  %v1653_v18 = vpack.c.bf16 %v378_v15, %v377_v14  ;;  %v379_v20 = vld [vmem:[#allocation5 + $0xb0] sm:$0xff]  ;;  %p2054_p4 = scmp.ne.s32.totalorder %s2424_s18, %s2053_s27  ;;  %s2152_s17 = smov [#allocation11]  }
  0x8b   : > { %1672 = vmatpush3.bf16.msra.mxu1 %v1671_v9  ;;  %1649 = vmatprep.subr.bf16.mxu0 %v2149_v0  ;;  %v1677_v19 = vpack.c.bf16 %v359_v17, %v358_v16  ;;  %v380_v21 = vld [vmem:[#allocation5 + $0xb8] sm:$0xff]  ;;  %v360_v22 = vld [vmem:[#allocation5 + $0x30] sm:$0xff]  ;;  %v381_v26 = vld [vmem:[#allocation5 + $0xc0] sm:$0xff]  ;;  %s2057_s20 = sshll.u32 %s2152_s17, 4  ;;  %s2058_s20 = int_to_ptr.vmem [resolvable:$false] %s2057_s20 }
  0x8c   : > { %1673 = vmatprep.subr.bf16.mxu1 %v2149_v0  ;;  %v361_v23 = vld [vmem:[#allocation5 + $0x38] sm:$0xff]  ;;  %v1656_v24 = vpack.c.bf16 %v380_v21, %v379_v20  ;;  %v382_v27 = vld [vmem:[#allocation5 + $0xc8] sm:$0xff]  ;;  %v362_v28 = vld [vmem:[#allocation5 + $0x40] sm:$0xff]  ;;  %p2055_p13 = pnand %p2054_p4, %p2505_p1  ;;  %s2059_s9 = scalar_lea.vmem %s2058_s20, 512 }
  0x8d   : > { %v1680_v25 = vpack.c.bf16 %v361_v23, %v360_v22  ;;  %v363_v29 = vld [vmem:[#allocation5 + $0x48] sm:$0xff]  ;;  %v1659_v30 = vpack.c.bf16 %v382_v27, %v381_v26  ;;  %v383_v32 = vld [vmem:[#allocation5 + $0xd0] sm:$0xff]  ;;  %v384_v33 = vld [vmem:[#allocation5 + $0xd8] sm:$0xff]  ;;  %p2060_p10 = scmp.lt.s32.totalorder %s2424_s18, %s2058_s20  ;;  %p2061_p11 = scmp.lt.s32.totalorder %s2059_s9, %s2053_s27 }
  0x8e   : > { %1651 = vmatpush3.bf16.msra.mxu0 %v1650_v12  ;;  %v1683_v31 = vpack.c.bf16 %v363_v29, %v362_v28  ;;  %v364_v34 = vld [vmem:[#allocation5 + $0x50] sm:$0xff]  ;;  %v365_v35 = vld [vmem:[#allocation5 + $0x58] sm:$0xff]  ;;  %v1662_v36 = vpack.c.bf16 %v384_v33, %v383_v32  ;;  %v385_v38 = vld [vmem:[#allocation5 + $0xe0] sm:$0xff]  ;;  %p2056_p8 = pneg %p2055_p13 }
  0x8f   : > { %1675 = vmatpush3.bf16.msra.mxu1 %v1674_v13  ;;  %1652 = vmatprep.subr.bf16.mxu0 %v2149_v0  ;;  %v1686_v37 = vpack.c.bf16 %v365_v35, %v364_v34  ;;  %v386_v39 = vld [vmem:[#allocation5 + $0xe8] sm:$0xff]  ;;  %v366_v40 = vld [vmem:[#allocation5 + $0x60] sm:$0xff]  ;;  %v387_v44 = vld [vmem:[#allocation5 + $0xf0] sm:$0xff]  ;;  %p2062_p0 = por %p2061_p11, %p2060_p10 }
  0x90   : > { %1676 = vmatprep.subr.bf16.mxu1 %v2149_v0  ;;  %v367_v41 = vld [vmem:[#allocation5 + $0x68] sm:$0xff]  ;;  %v1665_v42 = vpack.c.bf16 %v386_v39, %v385_v38  ;;  %v388_v45 = vld [vmem:[#allocation5 + $0xf8] sm:$0xff]  ;;  %v368_v46 = vld [vmem:[#allocation5 + $0x70] sm:$0xff] }
  0x91   : > { %v1689_v43 = vpack.c.bf16 %v367_v41, %v366_v40  ;;  %v369_v47 = vld [vmem:[#allocation5 + $0x78] sm:$0xff]  ;;  %v1668_v48 = vpack.c.bf16 %v388_v45, %v387_v44  ;;  %v552_v50 = vld [vmem:[#allocation5 + $0x100] sm:$0xff]  ;;  %v553_v51 = vld [vmem:[#allocation5 + $0x108] sm:$0xff]  ;;  %p2063_p2 = pnand %p2062_p0, %p2056_p8 }
  0x92   : > { %1654 = vmatpush3.bf16.msra.mxu0 %v1653_v18  ;;  %v1692_v49 = vpack.c.bf16 %v369_v47, %v368_v46  ;;  %v370_v52 = vld [vmem:[#allocation2 + $0x2] sm:$0xff]  ;;  %v1695_v53 = vpack.c.bf16 %v553_v51, %v552_v50  ;;  %v554_v55 = vld [vmem:[#allocation5 + $0x110] sm:$0xff]  ;;  %v371_v58 = vld [vmem:[#allocation2 + $0xa] sm:$0xff] }
  0x93   : > { %1678 = vmatpush3.bf16.msra.mxu1 %v1677_v19  ;;  %1655 = vmatprep.subr.bf16.mxu0 %v2149_v0  ;;  %v351_v54 = vld [vmem:[#allocation2] sm:$0xff]  ;;  %v556_v59 = vld [vmem:[#allocation5 + $0x120] sm:$0xff]  ;;  %v557_v60 = vld [vmem:[#allocation5 + $0x128] sm:$0xff] }
  0x94   : > { %1679 = vmatprep.subr.bf16.mxu1 %v2149_v0  ;;  %v555_v56 = vld [vmem:[#allocation5 + $0x118] sm:$0xff]  ;;  %v352_v61 = vld [vmem:[#allocation2 + $0x8] sm:$0xff]  ;;  %v1701_v62 = vpack.c.bf16 %v557_v60, %v556_v59  ;;  %v372_v63 = vld [vmem:[#allocation2 + $0x12] sm:$0xf] }
  0x95   : > { %v1698_v57 = vpack.c.bf16 %v555_v56, %v554_v55  ;;  %v558_v2 = vld [vmem:[#allocation5 + $0x130] sm:$0xff]  ;;  %v559_v3 = vld [vmem:[#allocation5 + $0x138] sm:$0xff]  ;;  %v353_v4 = vld [vmem:[#allocation2 + $0x10] sm:$0xf] }
  0x96   : > { %1657 = vmatpush3.bf16.msra.mxu0 %v1656_v24  ;;  %v1704_v5 = vpack.c.bf16 %v559_v3, %v558_v2  ;;  %v560_v6 = vld [vmem:[#allocation5 + $0x140] sm:$0xff]  ;;  %v561_v7 = vld [vmem:[#allocation5 + $0x148] sm:$0xff]  ;;  %v562_v9 = vld [vmem:[#allocation5 + $0x150] sm:$0xff] }
  0x97   : > { %1681 = vmatpush3.bf16.msra.mxu1 %v1680_v25  ;;  %1658 = vmatprep.subr.bf16.mxu0 %v2149_v0  ;;  %v1707_v8 = vpack.c.bf16 %v561_v7, %v560_v6  ;;  %v563_v10 = vld [vmem:[#allocation5 + $0x158] sm:$0xff]  ;;  %v564_v12 = vld [vmem:[#allocation5 + $0x160] sm:$0xff]  ;;  %v565_v13 = vld [vmem:[#allocation5 + $0x168] sm:$0xff] }
  0x98   : > { %1682 = vmatprep.subr.bf16.mxu1 %v2149_v0  ;;  %v1710_v11 = vpack.c.bf16 %v563_v10, %v562_v9  ;;  %v1713_v14 = vpack.c.bf16 %v565_v13, %v564_v12  ;;  %v566_v15 = vld [vmem:[#allocation5 + $0x170] sm:$0xff]  ;;  %v567_v16 = vld [vmem:[#allocation5 + $0x178] sm:$0xff]  ;;  %v550_v19 = vld [vmem:[#allocation2 + $0xc] sm:$0xff] }
  0x99   : > { %v1716_v17 = vpack.c.bf16 %v567_v16, %v566_v15  ;;  %v549_v18 = vld [vmem:[#allocation2 + $0x4] sm:$0xff]  ;;  %v551_v20 = vld [vmem:[#allocation2 + $0x14] sm:$0xf]  ;;  %v725_v29 = vld [vmem:[#allocation8 + $0xb0] sm:$0xff] }
  0x9a   : > { %1660 = vmatpush3.bf16.msra.mxu0 %v1659_v30  ;;  %v719_v21 = vld [vmem:[#allocation8 + $0x80] sm:$0xff]  ;;  %v720_v22 = vld [vmem:[#allocation8 + $0x88] sm:$0xff]  ;;  %v722_v24 = vld [vmem:[#allocation8 + $0x98] sm:$0xff] }
  0x9b   : > { %1684 = vmatpush3.bf16.msra.mxu1 %v1683_v31  ;;  %1661 = vmatprep.subr.bf16.mxu0 %v2149_v0  ;;  %v1718_v23 = vpack.c.bf16 %v720_v22, %v719_v21  ;;  %v723_v26 = vld [vmem:[#allocation8 + $0xa0] sm:$0xff]  ;;  %v724_v27 = vld [vmem:[#allocation8 + $0xa8] sm:$0xff]  ;;  %v729_v34 = vld [vmem:[#allocation8 + $0xd0] sm:$0xff] }
  0x9c   : > { %1685 = vmatprep.subr.bf16.mxu1 %v2149_v0  ;;  %v1726_v28 = vpack.c.bf16 %v724_v27, %v723_v26  ;;  %v727_v31 = vld [vmem:[#allocation8 + $0xc0] sm:$0xff]  ;;  %v728_v32 = vld [vmem:[#allocation8 + $0xc8] sm:$0xff]  ;;  %v730_v35 = vld [vmem:[#allocation8 + $0xd8] sm:$0xff] }
  0x9d   : > { %v1734_v33 = vpack.c.bf16 %v728_v32, %v727_v31  ;;  %v732_v38 = vld [vmem:[#allocation8 + $0xe8] sm:$0xff]  ;;  %v733_v40 = vld [vmem:[#allocation8 + $0xf0] sm:$0xff]  ;;  %v734_v41 = vld [vmem:[#allocation8 + $0xf8] sm:$0xff] }
  0x9e   : > { %1663 = vmatpush3.bf16.msra.mxu0 %v1662_v36  ;;  %v1738_v36 = vpack.c.bf16 %v730_v35, %v729_v34  ;;  %v702_v44 = vld [vmem:[#allocation8 + $0x8] sm:$0xff]  ;;  %v993_v46 = vld [vmem:[#allocation10] sm:$0xff]  ;;  %v996_v50 = vld [vmem:[#allocation10 + $0x18] sm:$0xff] }
  0x9f   : > { %1687 = vmatpush3.bf16.msra.mxu1 %v1686_v37  ;;  %1664 = vmatprep.subr.bf16.mxu0 %v2149_v0  ;;  %v731_v37 = vld [vmem:[#allocation8 + $0xe0] sm:$0xff]  ;;  %v994_v47 = vld [vmem:[#allocation10 + $0x8] sm:$0xff]  ;;  %v999_v55 = vld [vmem:[#allocation10 + $0x30] sm:$0xff] }
  0xa0   : > { %1688 = vmatprep.subr.bf16.mxu1 %v2149_v0  ;;  %v1742_v39 = vpack.c.bf16 %v732_v38, %v731_v37  ;;  %v1000_v56 = vld [vmem:[#allocation10 + $0x38] sm:$0xff]  ;;  %v1002_v59 = vld [vmem:[#allocation10 + $0x48] sm:$0xff]  ;;  %v1005_v2 = vld [vmem:[#allocation10 + $0x60] sm:$0xff] }
  0xa1   : > { %v1006_v3 = vld [vmem:[#allocation10 + $0x68] sm:$0xff]  ;;  %v1008_v6 = vld [vmem:[#allocation10 + $0x78] sm:$0xff] }
  0xa2   : > { %1666 = vmatpush3.bf16.msra.mxu0 %v1665_v42  ;;  %v701_v42 = vld [vmem:[#allocation8] sm:$0xff]  ;;  %v1242_v26 = vld [vmem:[%s2478_s2] ss:$0 sm:$0xff] }
  0xa3   : > { %1690 = vmatpush3.bf16.msra.mxu1 %v1689_v43  ;;  %1667 = vmatprep.subr.bf16.mxu0 %v2149_v0  ;;  %v1746_v43 = vpack.c.bf16 %v734_v41, %v733_v40  ;;  %v2402_v45 = vpack.c.bf16 %v702_v44, %v701_v42  ;;  %v703_v44 = vld [vmem:[#allocation8 + $0x10] sm:$0xff] }
  0xa4   : > { %1691 = vmatprep.subr.bf16.mxu1 %v2149_v0 }
  0xa6   : > { %1669 = vmatpush3.bf16.msra.mxu0 %v1668_v48  ;;  %v1814_v48 = vpack.c.bf16 %v994_v47, %v993_v46  ;;  %v704_v46 = vld [vmem:[#allocation8 + $0x18] sm:$0xff] }
  0xa7   : > { %1693 = vmatpush3.bf16.msra.mxu1 %v1692_v49  ;;  %1694 = vmatprep.subr.bf16.mxu0 %v2149_v0  ;;  %v995_v49 = vld [vmem:[#allocation10 + $0x10] sm:$0xff]  ;;  %v1754_v47 = vpack.c.bf16 %v704_v46, %v703_v44 }
  0xa8   : > { %1719 = vmatprep.subr.bf16.mxu1 %v1718_v23  ;;  %v1818_v51 = vpack.c.bf16 %v996_v50, %v995_v49  ;;  %v705_v49 = vld [vmem:[#allocation8 + $0x20] sm:$0xff]  ;;  %v706_v50 = vld [vmem:[#allocation8 + $0x28] sm:$0xff] }
  0xa9   : > { %1416 = vmatmul.mubr.f32.vlgmr.msra.gmra.mrb[0].mxu0 %v370_v52  ;;  %v997_v52 = vld [vmem:[#allocation10 + $0x20] sm:$0xff] }
  0xaa   : > { %1457 = vmatmul.mubr.f32.vlgmr.msra.gmra.mrb[0].mxu1 %v351_v54  ;;  %1696 = vmatpush3.bf16.msra.mxu0 %v1695_v53  ;;  %v998_v53 = vld [vmem:[#allocation10 + $0x28] sm:$0xff] }
  0xab   : > { %1697 = vmatprep.subr.bf16.mxu0 %v2149_v0  ;;  %1418 = vmatprep.mubr.msk.f32.mxu0 %vm2150_vm0, %v2151_v1  ;;  %v1822_v54 = vpack.c.bf16 %v998_v53, %v997_v52  ;;  %v707_v52 = vld [vmem:[#allocation8 + $0x30] sm:$0xff]  ;;  %v708_v53 = vld [vmem:[#allocation8 + $0x38] sm:$0xff] }
  0xac   : > { %1459 = vmatprep.mubr.msk.f32.mxu1 %vm2150_vm0, %v2151_v1  ;;  %1721 = vmatpush3.bf16.msra.mxu1 %v1718_v23 }
  0xad   : > { %1419 = vmatmul.mubr.f32.gmra.mrb[2].mxu0 %v371_v58  ;;  %v1001_v58 = vld [vmem:[#allocation10 + $0x40] sm:$0xff] }
  0xae   : > { %1699 = vmatpush3.bf16.msra.mxu0 %v1698_v57  ;;  %1460 = vmatmul.mubr.f32.gmra.mrb[2].mxu1 %v352_v61  ;;  %v1826_v57 = vpack.c.bf16 %v1000_v56, %v999_v55  ;;  %v1830_v60 = vpack.c.bf16 %v1002_v59, %v1001_v58  ;;  %v709_v55 = vld [vmem:[#allocation8 + $0x40] sm:$0xff]  ;;  %v710_v56 = vld [vmem:[#allocation8 + $0x48] sm:$0xff]  ;;  %v711_v58 = vld [vmem:[#allocation8 + $0x50] sm:$0xff] }
  0xaf   : > { %1700 = vmatprep.subr.bf16.mxu0 %v2149_v0  ;;  %1421 = vmatprep.mubr.msk.f32.mxu0 %vm2150_vm0, %v2151_v1  ;;  %v712_v59 = vld [vmem:[#allocation8 + $0x58] sm:$0xff] }
  0xb0   : > { %1462 = vmatprep.mubr.msk.f32.mxu1 %vm2150_vm0, %v2151_v1 }
  0xb1   : > { %1422 = vmatmul.mubr.f32.gmra.mrb[4].mxu0 %v372_v63 }
  0xb2   : > { %1702 = vmatpush3.bf16.msra.mxu0 %v1701_v62  ;;  %1463 = vmatmul.mubr.f32.gmra.mrb[4].mxu1 %v353_v4  ;;  %v1004_v62 = vld [vmem:[#allocation10 + $0x58] sm:$0xff]  ;;  %v1838_v4 = vpack.c.bf16 %v1006_v3, %v1005_v2 }
  0xb3   : > { %1703 = vmatprep.subr.bf16.mxu0 %v2149_v0  ;;  %1497 = vmatprep.mubr.msk.f32.mxu0 %vm2150_vm0, %v2151_v1  ;;  %v716_v2 = vld [vmem:[#allocation8 + $0x78] sm:$0xff] }
  0xb6   : > { %1705 = vmatpush3.bf16.msra.mxu0 %v1704_v5  ;;  %v1007_v5 = vld [vmem:[#allocation10 + $0x70] sm:$0xff] }
  0xb7   : > { %1706 = vmatprep.subr.bf16.mxu0 %v2149_v0  ;;  %v1842_v7 = vpack.c.bf16 %v1008_v6, %v1007_v5  ;;  %v888_v5 = vld [vmem:[#allocation8 + $0x108] sm:$0xff] }
  0xba   : > { %1708 = vmatpush3.bf16.msra.mxu0 %v1707_v8  ;;  %v992_v8 = vld [vmem:[#allocation2 + $0x10] sm:$0xff] }
  0xbb   : > { %1709 = vmatprep.subr.bf16.mxu0 %v2149_v0 }
  0xbe   : > { %1711 = vmatpush3.bf16.msra.mxu0 %v1710_v11 }
  0xbf   : > { %1712 = vmatprep.subr.bf16.mxu0 %v2149_v0 }
  0xc2   : > { %1714 = vmatpush3.bf16.msra.mxu0 %v1713_v14 }
  0xc3   : > { %1715 = vmatprep.subr.bf16.mxu0 %v2149_v0  ;;  %v721_v0 = vld [vmem:[#allocation8 + $0x90] sm:$0xff] }
  0xc4   : > { %v1722_v25 = vpack.c.bf16 %v722_v24, %v721_v0  ;;  %v673_v0 = vlaneseq }
  0xc6   : > { %1717 = vmatpush3.bf16.msra.mxu0 %v1716_v17  ;;  %1723 = vmatprep.subr.bf16.mxu1 %v1722_v25  ;;  %v674_v24 = vshrl.u32 %v673_v0, 7  ;;  %v900_v0 = vld [vmem:[#allocation8 + $0x168] sm:$0xff] }
  0xc7   : > { %1725 = vmatpush3.bf16.msra.mxu1 %v1722_v25  ;;  %1815 = vmatprep.subr.bf16.mxu0 %v1814_v48 }
  0xc8   : > { %1727 = vmatprep.subr.bf16.mxu1 %v1726_v28  ;;  %v678_v27 = vadd.s32 4294967292, %v674_v24 }
  0xc9   : > { %1498 = vmatmul.mubr.f32.vlgmr.msra.gmra.mrb[6].mxu0 %v549_v18 }
  0xca   : > { %1500 = vmatprep.mubr.msk.f32.mxu0 %vm2150_vm0, %v2151_v1  ;;  %1817 = vmatpush3.bf16.msra.mxu0 %v1814_v48  ;;  %vm681_vm1 = vcmp.ge.s32.totalorder %v678_v27, 0 }
  0xcb   : > { %1729 = vmatpush3.bf16.msra.mxu1 %v1726_v28  ;;  %1819 = vmatprep.subr.bf16.mxu0 %v1818_v51 }
  0xcd   : > { %1501 = vmatmul.mubr.f32.gmra.mrb[8].mxu0 %v550_v19 }
  0xce   : > { %1503 = vmatprep.mubr.msk.f32.mxu0 %vm2150_vm0, %v2151_v1  ;;  %v726_v1 = vld [vmem:[#allocation8 + $0xb8] sm:$0xff]  ;;  %1821 = vmatpush3.bf16.msra.mxu0 %v1818_v51  ;;  %v1758_v51 = vpack.c.bf16 %v706_v50, %v705_v49 }
  0xcf   : > { %v1730_v30 = vpack.c.bf16 %v726_v1, %v725_v29  ;;  %1823 = vmatprep.subr.bf16.mxu0 %v1822_v54 }
  0xd1   : > { %1504 = vmatmul.mubr.f32.gmra.mrb[10].mxu0 %v551_v20  ;;  %1731 = vmatprep.subr.bf16.mxu1 %v1730_v30 }
  0xd2   : > { %1643 = vmatprep.mubr.f32.mxu0 %v352_v61  ;;  %1733 = vmatpush3.bf16.msra.mxu1 %v1730_v30  ;;  %v1003_v61 = vld [vmem:[#allocation10 + $0x50] sm:$0xff] }
  0xd3   : > { %1735 = vmatprep.subr.bf16.mxu1 %v1734_v33  ;;  %1825 = vmatpush3.bf16.msra.mxu0 %v1822_v54  ;;  %v1834_v63 = vpack.c.bf16 %v1004_v62, %v1003_v61  ;;  %v1762_v54 = vpack.c.bf16 %v708_v53, %v707_v52  ;;  %v714_v61 = vld [vmem:[#allocation8 + $0x68] sm:$0xff] }
  0xd4   : > { %1827 = vmatprep.subr.bf16.mxu0 %v1826_v57 }
  0xd6   : > { %1737 = vmatpush3.bf16.msra.mxu1 %v1734_v33 }
  0xd7   : > { %1739 = vmatprep.subr.bf16.mxu1 %v1738_v36  ;;  %1829 = vmatpush3.bf16.msra.mxu0 %v1826_v57  ;;  %v1766_v57 = vpack.c.bf16 %v710_v56, %v709_v55 }
  0xd8   : > { %1831 = vmatprep.subr.bf16.mxu0 %v1830_v60 }
  0xda   : > { %1741 = vmatpush3.bf16.msra.mxu1 %v1738_v36 }
  0xdb   : > { %1743 = vmatprep.subr.bf16.mxu1 %v1742_v39  ;;  %1833 = vmatpush3.bf16.msra.mxu0 %v1830_v60  ;;  %v1770_v60 = vpack.c.bf16 %v712_v59, %v711_v58 }
  0xdc   : > { %1835 = vmatprep.subr.bf16.mxu0 %v1834_v63 }
  0xde   : > { %1745 = vmatpush3.bf16.msra.mxu1 %v1742_v39 }
  0xdf   : > { %1747 = vmatprep.subr.bf16.mxu1 %v1746_v43  ;;  %1837 = vmatpush3.bf16.msra.mxu0 %v1834_v63  ;;  %v715_v63 = vld [vmem:[#allocation8 + $0x70] sm:$0xff] }
  0xe0   : > { %1839 = vmatprep.subr.bf16.mxu0 %v1838_v4  ;;  %v1778_v3 = vpack.c.bf16 %v716_v2, %v715_v63 }
  0xe2   : > { %1749 = vmatpush3.bf16.msra.mxu1 %v1746_v43 }
  0xe3   : > { %1751 = vmatprep.subr.bf16.mxu1 %v2402_v45  ;;  %1841 = vmatpush3.bf16.msra.mxu0 %v1838_v4  ;;  %v887_v4 = vld [vmem:[#allocation8 + $0x100] sm:$0xff] }
  0xe4   : > { %1843 = vmatprep.subr.bf16.mxu0 %v1842_v7  ;;  %v1782_v6 = vpack.c.bf16 %v888_v5, %v887_v4 }
  0xe7   : > { %1845 = vmatpush3.bf16.msra.mxu0 %v1842_v7  ;;  %v889_v7 = vld [vmem:[#allocation8 + $0x110] sm:$0xff] }
  0xea   : > { %1644 = vmatmul.mubr.f32.vlgmr.msra.gmra.mrb[12].mxu0 %v992_v8  ;;  %v890_v8 = vld [vmem:[#allocation8 + $0x118] sm:$0xff] }
 0x17c   : > { %v455_v9 = vpop.f32.mrb[0].mxu0 }
 0x17d   : > { %v1417_v10 = vpop.f32.mrb[1].mxu0  ;;  %v535_v11 = vpop.f32.mrb[0].mxu1 }
 0x17e   : > { %v536_v12 = vadd.f32 %v535_v11, %v455_v9  ;;  %v1458_v13 = vpop.f32.mrb[1].mxu1  ;;  %v1786_v9 = vpack.c.bf16 %v890_v8, %v889_v7  ;;  %v891_v10 = vld [vmem:[#allocation8 + $0x120] sm:$0xff]  ;;  %v892_v11 = vld [vmem:[#allocation8 + $0x128] sm:$0xff] }
 0x17f   : > { %v1790_v13 = vpack.c.bf16 %v892_v11, %v891_v10 }
 0x180   : > { %v460_v14 = vpop.f32.mrb[2].mxu0 }
 0x181   : > { %v1420_v15 = vpop.f32.mrb[3].mxu0  ;;  %v540_v16 = vpop.f32.mrb[2].mxu1 }
 0x182   : > { %v541_v17 = vadd.f32 %v540_v16, %v460_v14  ;;  %v1461_v18 = vpop.f32.mrb[3].mxu1  ;;  %v893_v14 = vld [vmem:[#allocation8 + $0x130] sm:$0xff]  ;;  %v894_v15 = vld [vmem:[#allocation8 + $0x138] sm:$0xff] }
 0x183   : > { %v1794_v16 = vpack.c.bf16 %v894_v15, %v893_v14  ;;  %v896_v18 = vld [vmem:[#allocation8 + $0x148] sm:$0xff] }
 0x184   : > { %v465_v19 = vpop.f32.mrb[4].mxu0 }
 0x185   : > { %v1423_v20 = vpop.f32.mrb[5].mxu0  ;;  %v545_v21 = vpop.f32.mrb[4].mxu1 }
 0x186   : > { %v546_v22 = vadd.f32 %v545_v21, %v465_v19  ;;  %v1464_v23 = vpop.f32.mrb[5].mxu1  ;;  %v897_v20 = vld [vmem:[#allocation8 + $0x150] sm:$0xff]  ;;  %v898_v21 = vld [vmem:[#allocation8 + $0x158] sm:$0xff] }
 0x187   : > { %v899_v23 = vld [vmem:[#allocation8 + $0x160] sm:$0xff] }
 0x188   : > { %v1806_v24 = vpack.c.bf16 %v900_v0, %v899_v23 }
 0x19c   : > { %v634_v25 = vpop.f32.mrb[6].mxu0 }
 0x19d   : > { %v648_v28 = vadd.f32 %v634_v25, %v536_v12  ;;  %v1499_v29 = vpop.f32.mrb[7].mxu0  ;;  %v901_v25 = vld [vmem:[#allocation8 + $0x170] sm:$0xff] }
 0x19f   : > { %v658_v1 = vadd.f32 %v1242_v26, %v648_v28 }
 0x1a0   : > { %v639_v30 = vpop.f32.mrb[8].mxu0 }
 0x1a1   : > { %v661_v31 = vmax.f32 %v658_v1, 0.0  ;;  %v649_v32 = vadd.f32 %v639_v30, %v541_v17  ;;  %v1502_v33 = vpop.f32.mrb[9].mxu0  ;;  %v895_v17 = vld [vmem:[#allocation8 + $0x140] sm:$0xff]  ;;  %v1243_v30 = vld [vmem:[%s2480_s4] ss:$0 sm:$0xff] }
 0x1a2   : > { %v1798_v19 = vpack.c.bf16 %v896_v18, %v895_v17 }
 0x1a3   : > { %v693_v34 = vsel %vm681_vm1, %v661_v31, 0.0  ;;  %v659_v35 = vadd.f32 %v1242_v26, %v649_v32 }
 0x1a4   : > { %696 = vst [vmem:[#allocation3] sm:$0xff] %v693_v34  ;;  %v644_v36 = vpop.f32.mrb[10].mxu0 }
 0x1a5   : > { %v662_v37 = vmax.f32 %v659_v35, 0.0  ;;  %v650_v38 = vadd.f32 %v644_v36, %v546_v22  ;;  %v1505_v39 = vpop.f32.mrb[11].mxu0  ;;  %v1802_v22 = vpack.c.bf16 %v898_v21, %v897_v20 }
 0x1a7   : > { %697 = vst [vmem:[#allocation3 + $0x8] sm:$0xff] %v662_v37  ;;  %v660_v40 = vadd.f32 %v1242_v26, %v650_v38  ;;  %v902_v26 = vld [vmem:[#allocation8 + $0x178] sm:$0xff] }
 0x1a8   : > { %v1810_v27 = vpack.c.bf16 %v902_v26, %v901_v25 }
 0x1a9   : > { %v663_v41 = vmax.f32 %v660_v40, 0.0 }
 0x1ab   : > { %666 = vst [vmem:[#allocation3 + $0x10] sm:$0xf] %v663_v41 }
 0x1ae   : > { %v717_v42 = vld [vmem:[#allocation3 + $0x2] sm:$0xff] }
 0x1af   : > { %1538 = vmatprep.mubr.f32.mxu1 %v717_v42  ;;  %v885_v12 = vld [vmem:[#allocation3 + $0x4] sm:$0xff] }
 0x1b2   : > { %v686_v43 = vld [vmem:[#allocation3 + $0x10] sm:$0xf] }
 0x1b3   : > { %698 = vst [vmem:[#allocation3 + $0x10] sm:$0xf] %v686_v43 }
 0x1ba   : > { %v718_v48 = vld [vmem:[#allocation3 + $0xa] sm:$0xff] }
 0x1bb   : > { %1539 = vmatmul.mubr.f32.vlgmr.msra.gmra.mrb[6].mxu1 %v718_v48  ;;  %v886_v28 = vld [vmem:[#allocation3 + $0xc] sm:$0xff] }
 0x1bc   : > { %1753 = vmatpush3.bf16.msra.mxu1 %v2402_v45  ;;  %1944 = vmatprep.mubr.msk.f32.mxu1 %vm681_vm1, %v661_v31  ;;  %v713_v45 = vld [vmem:[#allocation8 + $0x60] sm:$0xff]  ;;  %v1244_v31 = vld [vmem:[%s2482_s6] ss:$0 sm:$0xff] }
 0x1bd   : > { %1755 = vmatprep.subr.bf16.mxu1 %v1754_v47  ;;  %v1774_v62 = vpack.c.bf16 %v714_v61, %v713_v45  ;;  %v1645_v29 = vpop.f32.mrb[12].mxu0 }
 0x1be   : > { %v1082_v1 = vpop.f32.mrb[13].mxu0  ;;  %v1088_v35 = vadd.f32 %v1645_v29, %v1244_v31 }
 0x1c0   : > { %1757 = vmatpush3.bf16.msra.mxu1 %v1754_v47 }
 0x1c1   : > { %1759 = vmatprep.subr.bf16.mxu1 %v1758_v51 }
 0x1c4   : > { %1761 = vmatpush3.bf16.msra.mxu1 %v1758_v51 }
 0x1c5   : > { %1763 = vmatprep.subr.bf16.mxu1 %v1762_v54 }
 0x1c8   : > { %1765 = vmatpush3.bf16.msra.mxu1 %v1762_v54 }
 0x1c9   : > { %1767 = vmatprep.subr.bf16.mxu1 %v1766_v57 }
 0x1cc   : > { %1769 = vmatpush3.bf16.msra.mxu1 %v1766_v57 }
 0x1cd   : > { %1771 = vmatprep.subr.bf16.mxu1 %v1770_v60 }
 0x1d0   : > { %1773 = vmatpush3.bf16.msra.mxu1 %v1770_v60 }
 0x1d1   : > { %1775 = vmatprep.subr.bf16.mxu1 %v1774_v62 }
 0x1d4   : > { %1777 = vmatpush3.bf16.msra.mxu1 %v1774_v62 }
 0x1d5   : > { %1779 = vmatprep.subr.bf16.mxu1 %v1778_v3 }
 0x1d8   : > { %1781 = vmatpush3.bf16.msra.mxu1 %v1778_v3 }
 0x1d9   : > { %1783 = vmatprep.subr.bf16.mxu1 %v1782_v6 }
 0x1db   : > { %1574 = vmatmul.mubr.f32.vlgmr.msra.gmra.mrb[6].mxu1 %v662_v37  ;;  %v1083_v37 = vadd.f32 %v1244_v31, %v1082_v1 }
 0x1dc   : > { %1785 = vmatpush3.bf16.msra.mxu1 %v1782_v6  ;;  %1608 = vmatprep.mubr.f32.mxu1 %v885_v12 }
 0x1dd   : > { %1787 = vmatprep.subr.bf16.mxu1 %v1786_v9 }
 0x1e0   : > { %1789 = vmatpush3.bf16.msra.mxu1 %v1786_v9 }
 0x1e1   : > { %1791 = vmatprep.subr.bf16.mxu1 %v1790_v13 }
 0x1e4   : > { %1793 = vmatpush3.bf16.msra.mxu1 %v1790_v13 }
 0x1e5   : > { %1795 = vmatprep.subr.bf16.mxu1 %v1794_v16 }
 0x1e8   : > { %1797 = vmatpush3.bf16.msra.mxu1 %v1794_v16 }
 0x1e9   : > { %1799 = vmatprep.subr.bf16.mxu1 %v1798_v19 }
 0x1ec   : > { %1801 = vmatpush3.bf16.msra.mxu1 %v1798_v19 }
 0x1ed   : > { %1803 = vmatprep.subr.bf16.mxu1 %v1802_v22 }
 0x1f0   : > { %1805 = vmatpush3.bf16.msra.mxu1 %v1802_v22 }
 0x1f1   : > { %1807 = vmatprep.subr.bf16.mxu1 %v1806_v24 }
 0x1f4   : > { %1809 = vmatpush3.bf16.msra.mxu1 %v1806_v24 }
 0x1f5   : > { %1811 = vmatprep.subr.bf16.mxu1 %v1810_v27 }
 0x1f8   : > { %1813 = vmatpush3.bf16.msra.mxu1 %v1810_v27 }
 0x1fb   : > { %1609 = vmatmul.mubr.f32.vlgmr.msra.gmra.mrb[6].mxu1 %v886_v28 }
 0x2ce   : > { %v1610_v32 = vpop.f32.mrb[6].mxu1 }
 0x2cf   : > { %v988_v33 = vadd.f32 %v1610_v32, %v1243_v30  ;;  %v969_v34 = vpop.f32.mrb[7].mxu1 }
 0x2d0   : > { %v987_v36 = vadd.f32 %v1243_v30, %v969_v34 }
 0x2d1   : > { %v990_v38 = vmax.f32 %v988_v33, 0.0 }
 0x2d2   : > { %v989_v39 = vmax.f32 %v987_v36, 0.0 }
 0x2d3   : > { %v1092_v40 = vadd.f32 %v1088_v35, %v990_v38 }
 0x2d4   : > { %v1091_v41 = vadd.f32 %v1083_v37, %v989_v39 }
 0x2d5   : > { %v1094_v42 = vmax.f32 %v1092_v40, 0.0 }
 0x2d6   : > { %v1093_v43 = vmax.f32 %v1091_v41, 0.0 }
 0x2d7   : > { %1096 = vst [vmem:[%s2358_s3 + $0x8] sm:$0xff] %v1094_v42 }
 0x2d8   : > { %1095 = vst [vmem:[%s2358_s3] sm:$0xff] %v1093_v43 }
 0x2d9   : > { %2066 = shalt.err (!%p2063_p2)
}
 0x2da   : > { %s2067_s19 = scalar_lea.hbm %s2422_s10, 256  ;;  %s2071_s26 = scalar_lea.hbm %s2483_s7, 512 }
 0x2db   : > { %p2068_p3 = scmp.ne.s32.totalorder %s2422_s10, %s2067_s19  ;;  %p2072_p7 = scmp.lt.u32.totalorder %s2422_s10, %s2483_s7 }
 0x2dc   : > { %p2073_p9 = scmp.lt.u32.totalorder %s2071_s26, %s2067_s19  ;;  %p2075_p4 = scmp.lt.u32.totalorder %s2067_s19, %s2422_s10 }
 0x2dd   : > { %p2069_p5 = pnand %p2068_p3, %p2505_p1 }
 0x2de   : > { %p2074_p12 = por %p2073_p9, %p2072_p7 }
 0x2df   : > { %p2070_p6 = pneg %p2069_p5 }
 0x2e0   : > { %p2076_p13 = por %p2075_p4, %p2074_p12 }
 0x2e2   : > { %p2077_p8 = pnand %p2076_p13, %p2070_p6 }
 0x2e4   : > { %2080 = shalt.err (!%p2077_p8)
}
 0x2e5   : > { %s2153_s22 = smov 128   ;;  %s2154_s23 = smov 8  }
 0x2e6   : > { %1862 = dma.vmem_to_hbm [thread:$0]  (%p2505_p1), %s2424_s18, 256, %s2422_s10, %s2430_s16, %s2153_s22, %s2153_s22, %s2154_s23  }
 0x2e7 PF: > { %p1884_p10 = scmp.ge.s32.totalorder %s2141_s29, 2  ;;  %s1127_s28 = sand.u32 1, %s2121_s24  }
 0x2e8   : > { %p2506_p11 = scmp.ne.s32.totalorder %s2496_s13, 0  ;;  %s1128_s14 = scalar_lea.sflag [#allocation7], %s1127_s28 }
 0x2ea   : > { %p1875_p0 = pnand %p1884_p10, %p2506_p11 }
 0x2ec   : > { %2116 = dma.done.wait (!%p1875_p0), %s1128_s14, 256  }
 0x2ed   : > { %2118 = vsyncadd (!%p1875_p0), %s1128_s14, 4294967040  ;;  %s22_s29 = sadd.s32 1, %s2141_s29   ;;  %s2507_s30 = sld [smem:[#allocation22_spill]] }
 0x2ee   : > { %p19_p2 = scmp.ge.s32.totalorder %s22_s29, 4   ;;  %s2508_s26 = sld [smem:[#allocation25_spill]] }
 0x2ef   : > { %s2509_s27 = sld [smem:[#allocation23_spill]]  ;;  %s2510_s28 = sld [smem:[#allocation24_spill]] }
 0x2f0   : > { %s2511_s24 = smov %s2125_s25  ;;  %21 = sbr.rel (!%p19_p2) target bundleno = 8 (0x8), region = 116 }
 0x2f3   : > { %s2512_s25 = smov %s2507_s30 }
 0x2f7   :  { %1133 = vsyncpa [#allocation6], 1 }
 0x2f8   :  { %1135 = vsyncpa [#allocation6 + $0x1], 1 }
 0x2f9   :  { %1136 = vsyncpa [#allocation9], 1 }
 0x2fa   :  { %1137 = vsyncpa [#allocation7], 1 }
 0x2fb   :  { %1139 = vsyncpa [#allocation7 + $0x1], 1 }
 0x2fc   :  { %1140 = vsyncmov [#allocation4] }
 0x2ff   :  { %s1141_s11 = vpop.sfrf %1140 }
 0x300   :  { %p1250_p1 = scmp.ne.s32.totalorder %s1141_s11, 0 }
 0x302   :  { %1145 = shalt.err (%p1250_p1)  }
 0x303   :  { %1147 = vsyncmov [#allocation4 + $0x1] }
 0x306   :  { %s1148_s13 = vpop.sfrf %1147 }
 0x307   :  { %p1251_p3 = scmp.ne.s32.totalorder %s1148_s13, 0 }
 0x309   :  { %1152 = shalt.err (%p1251_p3)  }

</bundles_post_ra>
